<compile_context>
chip_gen: v6e
topology: v6e:2x2x1
jax: 0.10.0
libtpu: 0.0.40
codegen_flags: <defaults>
</compile_context>

<pallas_src>
import numpy as np
import jax
import jax.numpy as jnp
from jax import lax
from jax.experimental import pallas as pl
from jax.experimental.pallas import tpu as pltpu


def _arap_quadform_kernel(l3_ref, j_ref, sj_ref, m_ref):
    """M = J^T L3 J - (SJ)^T (SJ), with SJ = Cinv^{1/2} B^T J, per batch element."""
    L3 = l3_ref[...]          # [3Np, 3Np] bf16, batch-shared (resident in VMEM)
    Jf = j_ref[0]             # [3Np, D]   f32
    SJ = sj_ref[0]            # [3Np, D]   f32
    Jb = Jf.astype(jnp.bfloat16)

    # First term: J^T L3 J  (MXU bf16 matmul, f32 accumulation).
    LJ = jnp.dot(L3, Jb, preferred_element_type=jnp.float32)            # [3Np, D]
    JTLJ = lax.dot_general(Jf, LJ, (((0,), (0,)), ((), ())),
                           preferred_element_type=jnp.float32)          # [D, D]
    # Second term: (SJ)^T (SJ)  ==  (B^T J)^T Cinv (B^T J).
    G = lax.dot_general(SJ, SJ, (((0,), (0,)), ((), ())),
                        preferred_element_type=jnp.float32)             # [D, D]
    m_ref[0] = JTLJ - G


def arap_quadform(L3_bf16, J_f32, SJ_f32):
    """L3: [3Np,3Np] bf16 (batch-shared); J, SJ: [B,3Np,D] f32 -> M: [B,D,D] f32."""
    Bsz, threeN_p, D = J_f32.shape
    # TODO(synk): for large 3N, K-tile the contraction (grid=(B, 3N//tk)) and
    # batch J columns ([3N, B*D]) so the MXU output dim is >=256; unnecessary
    # at these demo shapes.
    return pl.pallas_call(
        _arap_quadform_kernel,
        out_shape=jax.ShapeDtypeStruct((Bsz, D, D), jnp.float32),
        grid=(Bsz,),
        in_specs=[
            pl.BlockSpec((threeN_p, threeN_p), lambda b: (0, 0)),     # L3 (shared)
            pl.BlockSpec((1, threeN_p, D), lambda b: (b, 0, 0)),      # J[b]
            pl.BlockSpec((1, threeN_p, D), lambda b: (b, 0, 0)),      # SJ[b]
        ],
        out_specs=pl.BlockSpec((1, D, D), lambda b: (b, 0, 0)),
        compiler_params=pltpu.CompilerParams(
            dimension_semantics=("parallel",),       # shard batch over TCs
            vmem_limit_bytes=32 * 1024 * 1024),
    )(L3_bf16, J_f32, SJ_f32)


class ARAP:
    def __init__(self, template_face, num_points):
        N = num_points
        self.N = N
        f = np.asarray(template_face)
        adj = np.zeros((N, N))
        adj[f[:, 0], f[:, 1]] = 1
        adj[f[:, 1], f[:, 2]] = 1
        adj[f[:, 0], f[:, 2]] = 1
        adj = adj + adj.T
        e0, e1 = np.where(adj > 0)
        self.e0 = jnp.asarray(e0, jnp.int32)
        self.e1 = jnp.asarray(e1, jnp.int32)
        self.edge_weight = jnp.ones((e0.shape[0],), jnp.float32)

        # Dense Laplacian kron I3:  L3 = 2 * kron(D - A, I3)
        A = (adj > 0).astype(np.float32)
        deg = A.sum(axis=1)
        L = 2.0 * (np.diag(deg) - A)
        L3 = np.kron(L, np.eye(3, dtype=np.float32))

        threeN = 3 * N
        self.threeN = threeN
        self.threeN_p = threeN + ((-threeN) % 8)        # sublane-align rows
        L3p = np.zeros((self.threeN_p, self.threeN_p), np.float32)
        L3p[:threeN, :threeN] = L3
        # L3 entries are small integers -> exactly representable in bf16.
        self.L3_bf16 = jnp.asarray(L3p, jnp.bfloat16)

    def __call__(self, x, J):
        """x: [B, N, 3] point locations.  J: [B, N*3, D] Jacobian."""
        N = self.N
        e0, e1, w = self.e0, self.e1, self.edge_weight
        Bsz = x.shape[0]
        D = J.shape[-1]
        eye3 = jnp.eye(3, dtype=jnp.float32)

        edge_vecs = x[:, e0, :] - x[:, e1, :]                       # [B, E, 3]
        vx, vy, vz = edge_vecs[..., 0], edge_vecs[..., 1], edge_vecs[..., 2]
        zero = jnp.zeros_like(vx)
        # skew(v) = [[0,-vz,vy],[vz,0,-vx],[-vy,vx,0]] per edge, [B, E, 3, 3]
        skew = jnp.stack([
            jnp.stack([zero, -vz, vy], axis=-1),
            jnp.stack([vz, zero, -vx], axis=-1),
            jnp.stack([-vy, vx, zero], axis=-1)], axis=-2)
        skew = skew * w[None, :, None, None]

        # Per-node C blocks:  C_n = sum_{e: e0=n} w * (|v|^2 I - v v^T).
        vsq = (edge_vecs * edge_vecs).sum(-1)                       # [B, E]
        outer = edge_vecs[..., :, None] * edge_vecs[..., None, :]   # [B, E, 3, 3]
        Cblk_e = (vsq[..., None, None] * eye3 - outer) * w[None, :, None, None]
        Cblk = jnp.zeros((Bsz, N, 3, 3), jnp.float32).at[:, e0].add(Cblk_e)

        # Robust Cinv^{1/2}: eigh-based pinv factor with R^T R = pinv(C_n).
        # (PyTorch uses inverse() with a pinv fallback; this covers both and
        # keeps the second quadratic-form term exactly PSD.)
        # TODO(synk): eigh has no Pallas equivalent -> plain JAX (O(N) tiny 3x3s).
        lam, U = jnp.linalg.eigh(Cblk)                              # [B,N,3], [B,N,3,3]
        tol = jnp.maximum(lam[..., -1:], 0.0) * 1e-7 + 1e-12
        ok = lam > tol
        inv_sqrt = jnp.where(ok, 1.0 / jnp.sqrt(jnp.where(ok, lam, 1.0)), 0.0)
        R = inv_sqrt[..., :, None] * jnp.swapaxes(U, -1, -2)        # [B, N, 3, 3]

        # Edge-sparse application of B^T:  (B^T J)_n = sum over edges of
        # -skew_e @ J_block(e0), scattered into node rows e1 and e0.
        Jf = jnp.asarray(J, jnp.float32)
        J3 = Jf.reshape(Bsz, N, 3, D)                               # [B, N, 3, D]
        contrib = -jnp.einsum('beij,bejd->beid', skew, J3[:, e0])   # [B, E, 3, D]
        BTJ = jnp.zeros((Bsz, N, 3, D), jnp.float32)
        BTJ = BTJ.at[:, e1].add(contrib)
        BTJ = BTJ.at[:, e0].add(contrib)
        # Fold in the per-node pinv factor: SJ = blockdiag(R) @ (B^T J).
        SJ = jnp.einsum('bnij,bnjd->bnid', R, BTJ).reshape(Bsz, 3 * N, D)

        # Zero-pad 3N up to a multiple of 8 (zero rows do not change M).
        pad = self.threeN_p - self.threeN
        if pad:
            Jf = jnp.pad(Jf, ((0, 0), (0, pad), (0, 0)))
            SJ = jnp.pad(SJ, ((0, 0), (0, pad), (0, 0)))

        # Hot path: dense MXU matmuls in the Pallas kernel.
        M = arap_quadform(self.L3_bf16, Jf, SJ)                     # [B, D, D]

        # Symmetrize before eigvalsh (bf16 L3-stream introduces tiny asymmetry).
        M = 0.5 * (M + jnp.swapaxes(M, -1, -2))
        # TODO(synk): eigvalsh has no Pallas equivalent -> plain JAX.
        e = jnp.linalg.eigvalsh(M)
        e = jnp.sqrt(jnp.clip(e, 0.0))
        return e.sum(-1).mean()


def _make_grid_mesh(rows, cols):
    """Simple triangulated grid: (rows*cols) points, 2*(rows-1)*(cols-1) faces."""
    faces = []
    for r in range(rows - 1):
        for c in range(cols - 1):
            v00 = r * cols + c
            v01 = r * cols + c + 1
            v10 = (r + 1) * cols + c
            v11 = (r + 1) * cols + c + 1
            faces.append((v00, v01, v11))
            faces.append((v00, v11, v10))
    pts = np.stack(np.meshgrid(np.arange(rows, dtype=np.float32),
                               np.arange(cols, dtype=np.float32),
                               indexing="ij"), axis=-1).reshape(-1, 2)
    pts = np.concatenate([pts, np.zeros((pts.shape[0], 1), np.float32)], axis=1)
    return np.asarray(faces, np.int64), pts


if __name__ == "__main__":
    rows, cols = 4, 4
    faces, base_pts = _make_grid_mesh(rows, cols)
    N = rows * cols                      # 16 points
    Bsz, D = 2, 8                        # small shapes

    key = jax.random.PRNGKey(0)
    k1, k2 = jax.random.split(key)
    # x: base grid positions + small perturbation, [B, N, 3]
    x = (jnp.asarray(base_pts)[None] +
         0.1 * jax.random.normal(k1, (Bsz, N, 3), jnp.float32))
    # J: [B, N*3, D]
    J = jax.random.normal(k2, (Bsz, N * 3, D), jnp.float32)

    arap = ARAP(faces, N)
    out = arap(x, J)
    out = jax.block_until_ready(out)
    assert out.shape == () and jnp.isfinite(out)
    print("KERNEL_OK")
</pallas_src>

<mosaic_0001>
module attributes {stable_mosaic.version = 11 : i64} {
  func.func @_arap_quadform_kernel(%arg0: i32, %arg1: memref<48x48xbf16, #tpu.memory_space<vmem>>, %arg2: memref<1x48x8xf32, #tpu.memory_space<vmem>>, %arg3: memref<1x48x8xf32, #tpu.memory_space<vmem>>, %arg4: memref<1x8x8xf32, #tpu.memory_space<vmem>>) attributes {dimension_semantics = [#tpu.dimension_semantics<parallel>], iteration_bounds = array<i64: 2>, scalar_prefetch = 0 : i64, scratch_operands = 0 : i64, tpu.core_type = #tpu.core_type<tc>, window_params = [{pipeline_mode = #tpu.pipeline_mode<synchronous>, transform_indices = @transform_0, window_bounds = array<i64: 48, 48>}, {transform_indices = @transform_1, window_bounds = array<i64: 1, 48, 8>}, {transform_indices = @transform_2, window_bounds = array<i64: 1, 48, 8>}, {transform_indices = @transform_3, window_bounds = array<i64: 1, 8, 8>}]} {
    %c0 = arith.constant 0 : index
    %c0_0 = arith.constant 0 : index
    %0 = vector.load %arg1[%c0, %c0_0] : memref<48x48xbf16, #tpu.memory_space<vmem>>, vector<48x48xbf16>
    %c0_1 = arith.constant 0 : index
    %c0_2 = arith.constant 0 : index
    %c0_3 = arith.constant 0 : index
    %1 = vector.load %arg2[%c0_1, %c0_2, %c0_3] : memref<1x48x8xf32, #tpu.memory_space<vmem>>, vector<1x48x8xf32>
    %2 = vector.shape_cast %1 : vector<1x48x8xf32> to vector<48x8xf32>
    %c0_4 = arith.constant 0 : index
    %c0_5 = arith.constant 0 : index
    %c0_6 = arith.constant 0 : index
    %3 = vector.load %arg3[%c0_4, %c0_5, %c0_6] : memref<1x48x8xf32, #tpu.memory_space<vmem>>, vector<1x48x8xf32>
    %4 = vector.shape_cast %3 : vector<1x48x8xf32> to vector<48x8xf32>
    %5 = arith.truncf %2 : vector<48x8xf32> to vector<48x8xbf16>
    %cst = arith.constant dense<0.000000e+00> : vector<48x8xf32>
    %6 = tpu.matmul %0, %5, %cst {dimension_numbers = #tpu.dot_dimension_numbers<[1], [0], [0], [1], [0, 0, 1, 1], [], []>} : vector<48x48xbf16>, vector<48x8xbf16>, vector<48x8xf32> -> vector<48x8xf32>
    %cst_7 = arith.constant dense<0.000000e+00> : vector<8x8xf32>
    %7 = tpu.matmul %2, %6, %cst_7 {dimension_numbers = #tpu.dot_dimension_numbers<[0], [0], [1], [1], [0, 1, 1, 1], [], []>} : vector<48x8xf32>, vector<48x8xf32>, vector<8x8xf32> -> vector<8x8xf32>
    %cst_8 = arith.constant dense<0.000000e+00> : vector<8x8xf32>
    %8 = tpu.matmul %4, %4, %cst_8 {dimension_numbers = #tpu.dot_dimension_numbers<[0], [0], [1], [1], [0, 1, 1, 1], [], []>} : vector<48x8xf32>, vector<48x8xf32>, vector<8x8xf32> -> vector<8x8xf32>
    %9 = arith.subf %7, %8 : vector<8x8xf32>
    %c0_9 = arith.constant 0 : index
    %c0_10 = arith.constant 0 : index
    %c0_11 = arith.constant 0 : index
    %10 = vector.load %arg4[%c0_9, %c0_10, %c0_11] : memref<1x8x8xf32, #tpu.memory_space<vmem>>, vector<1x8x8xf32>
    %11 = vector.shape_cast %10 : vector<1x8x8xf32> to vector<8x8xf32>
    %12 = vector.shape_cast %9 : vector<8x8xf32> to vector<1x8x8xf32>
    tpu.vector_store %arg4[%c0_9, %c0_10, %c0_11], %12 {strides = array<i32>} : memref<1x8x8xf32, #tpu.memory_space<vmem>>, vector<1x8x8xf32>,
    return
  }
  func.func @transform_0(%arg0: i32) -> (i32, i32) {
    %c0_i32 = arith.constant 0 : i32
    %c0_i32_0 = arith.constant 0 : i32
    %c0_i32_1 = arith.constant 0 : i32
    return %c0_i32, %c0_i32_0 : i32, i32
  }
  func.func @transform_1(%arg0: i32) -> (i32, i32, i32) {
    %c0_i32 = arith.constant 0 : i32
    %c0_i32_0 = arith.constant 0 : i32
    %c0_i32_1 = arith.constant 0 : i32
    return %arg0, %c0_i32, %c0_i32_0 : i32, i32, i32
  }
  func.func @transform_2(%arg0: i32) -> (i32, i32, i32) {
    %c0_i32 = arith.constant 0 : i32
    %c0_i32_0 = arith.constant 0 : i32
    %c0_i32_1 = arith.constant 0 : i32
    return %arg0, %c0_i32, %c0_i32_0 : i32, i32, i32
  }
  func.func @transform_3(%arg0: i32) -> (i32, i32, i32) {
    %c0_i32 = arith.constant 0 : i32
    %c0_i32_0 = arith.constant 0 : i32
    %c0_i32_1 = arith.constant 0 : i32
    return %arg0, %c0_i32, %c0_i32_0 : i32, i32, i32
  }
}

</mosaic_0001>

<bundles_post_ra>
// kernel: tpu_custom_call.1
= control target key start
LH: loop header
LB: loop body
LE: loop exit
PB: predicated region body
PF: predicated region fallthrough
CT: control target
= control target key end

     0   :  { %8 = vsyncpa [#allocation3], 0  ;;  %s955_s0 = inlined_call_operand.vmem [shape: bf16[48,48], index: 0, kind: input, shape index: {}]   ;;  %s956_s1 = inlined_call_operand.vmem [shape: f32[2,48,8], index: 1, kind: input, shape index: {}]   ;;  %s957_s2 = inlined_call_operand.vmem [shape: f32[2,48,8], index: 2, kind: input, shape index: {}]   ;;  %s958_s3 = inlined_call_operand.hbm [shape: f32[2,8,8], index: 3, kind: output, shape index: {}]  }
   0x1   :  { %10 = vsyncpa [#allocation3 + $0x1], 0  ;;  %s808_s12 = smov 0   ;;  %s810_s13 = smov 0  }
   0x2   :  { %s812_s14 = smov 0   ;;  %s814_s15 = smov 0  }
   0x3 LB: > { %s829_s16 = sadd.s32 4294967295, %s783_s15   ;;  %s591_s17 = sadd.s32 4294967294, %s783_s15   ;;  %s783_s15 = sphi %s814_s15, %s964_s15   ;;  %s779_s14 = sphi %s812_s14, %s963_s14   ;;  %s775_s13 = sphi %s810_s13, %s962_s13   ;;  %s771_s12 = sphi %s808_s12, %s961_s12  }
   0x4   : > { %s833_s18 = sadd.s32 1, %s783_s15   ;;  %s96_s19 = sadd.s32 1, %s779_s14 }
   0x5   : > { %s93_s20 = ssub.s32 %s783_s15, %s833_s18  ;;  %p106_p0 = scmp.ne.s32.totalorder %s779_s14, %s775_s13 }
   0x6   : > { %p94_p1 = scmp.eq.s32.totalorder %s93_s20, 0  ;;  %p107_p2 = scmp.eq.s32.totalorder %s829_s16, 1 }
   0x7   : > { %p112_p3 = scmp.ne.s32.totalorder %s775_s13, %s771_s12  ;;  %p113_p4 = scmp.eq.s32.totalorder %s591_s17, 1 }
   0x8   : > { %s844_s21 = scalar_select %p94_p1, %s779_s14, %s96_s19  }
   0x9   : > { %p846_p5 = por %p107_p2, %p106_p0  ;;  %p850_p6 = por %p113_p4, %p112_p3 }
   0xa   : > { %p594_p7 = scmp.ge.s32.totalorder %s783_s15, 1  ;;  %p150_p8 = scmp.lt.s32.totalorder %s783_s15, 3 }
   0xc   : > { %p151_p9 = pnand %p594_p7, %p150_p8 }
   0xd   : > { %p179_p10 = scmp.lt.s32.totalorder (!%p151_p9), %s829_s16, 1  ;;  %s176_s11 = sand.u32 (!%p151_p9), 1, %s775_s13  }
   0xe   : > { %154 = sbr.rel (%p151_p9) target bundleno = 482 (0x1e2), region = 32  ;;  %s595_s17 = sshll.u32 (!%p151_p9), %s176_s11, 3 }
   0xf   : > { %s607_s19 = sshll.u32 (!%p151_p9), %s829_s16, 7  ;;  %s178_s20 = scalar_lea.vmem (!%p151_p9), [#allocation2], %s595_s17 }
  0x10   : > { %s920_s27 = scalar_lea.hbm (!%p151_p9), %s958_s3, %s607_s19 }
  0x13   : > { %v785_v0 = vmov 0.0   ;;  %vm786_vm0 = vmmov 0   ;;  %s180_s24 = scalar_select %p179_p10, %s829_s16, 1  ;;  %v720_v13 = vld [vmem:[%s955_s0] sm:$0xff]   ;;  %vm226_vm1 = vcmask 392192   ;;  %v721_v16 = vld [vmem:[%s955_s0 + $0x8] sm:$0xff]  }
  0x14   : > { %630 = vmatprep.subr.bf16.mxu0 %v785_v0  ;;  %636 = vmatprep.mubr.msk.bf16.mxu0 %vm786_vm0, %v785_v0  ;;  %v722_v18 = vld [vmem:[%s955_s0 + $0x10] sm:$0xff]   ;;  %vm504_vm2 = vcmask 64512   ;;  %s787_s16 = smov [#allocation2]  }
  0x15   : > { %648 = vmatprep.subr.mxu1 %v785_v0  ;;  %660 = vmatprep.mubr.msk.f32.mxu1 %vm786_vm0, %v785_v0  ;;  %s678_s25 = smul.u32 48, %s180_s24  ;;  %s520_s24 = sshll.u32 %s178_s20, 4  ;;  %s521_s24 = int_to_ptr.vmem [resolvable:$true] %s520_s24 }
  0x16   : > { %s723_s29 = scalar_lea.vmem %s521_s24, 128  ;;  %s727_s30 = sshll.u32 %s787_s16, 4  ;;  %s728_s30 = int_to_ptr.vmem [resolvable:$false] %s727_s30 }
  0x17   : > { %s183_s28 = scalar_lea.vmem %s956_s1, %s678_s25  ;;  %s870_s4 = scalar_lea.vmem %s957_s2, %s678_s25 }
  0x18   : > { %v200_v1 = vld [vmem:[%s183_s28 + $0x20] sm:$0xff]  ;;  %v201_v2 = vld [vmem:[%s183_s28 + $0x28] sm:$0xff]  ;;  %v198_v3 = vld [vmem:[%s183_s28 + $0x10] sm:$0xff]  ;;  %p724_p11 = scmp.ne.s32.totalorder %s521_s24, %s723_s29  ;;  %p730_p0 = scmp.lt.s32.totalorder %s521_s24, %s728_s30 }
  0x19   : > { %v210_v4 = vpack.c.bf16 %v201_v2, %v200_v1  ;;  %v199_v5 = vld [vmem:[%s183_s28 + $0x18] sm:$0xff]  ;;  %v196_v6 = vld [vmem:[%s183_s28] sm:$0xff]  ;;  %v197_v9 = vld [vmem:[%s183_s28 + $0x8] sm:$0xff]  ;;  %s507_s28 = scalar_lea.sflag [#allocation3], %s176_s11 }
  0x1a   : > { %293 = vxpose.xlu0.b32.start [1/6] (short) (narrow) %v196_v6, 8  ;;  %v873_v7 = vld [vmem:[%s870_s4] sm:$0xff]  ;;  %v209_v8 = vpack.c.bf16 %v199_v5, %v198_v3  ;;  %v203_v10 = vld [vmem:[%s870_s4 + $0x8] sm:$0xff]  ;;  %v208_v11 = vpack.c.bf16 %v197_v9, %v196_v6  ;;  %v204_v12 = vld [vmem:[%s870_s4 + $0x10] sm:$0xff]  ;;  %p725_p12 = pnand %p724_p11, %p846_p5 }
  0x1b   : > { %631 = vmatpush3.bf16.msra.mxu0 %v210_v4  ;;  %398 = vxpose.xlu1.b32.start [1/6] (short) (narrow) %v873_v7, 8  ;;  %v205_v14 = vld [vmem:[%s870_s4 + $0x18] sm:$0xff]  ;;  %v206_v15 = vld [vmem:[%s870_s4 + $0x20] sm:$0xff]  ;;  %v207_v17 = vld [vmem:[%s870_s4 + $0x28] sm:$0xff]  ;;  %s729_s4 = scalar_lea.vmem %s728_s30, 256 }
  0x1c   : > { %632 = vmatprep.subr.bf16.mxu0 %v785_v0  ;;  %p726_p13 = pneg %p725_p12  ;;  %p731_p1 = scmp.lt.s32.totalorder %s729_s4, %s723_s29 }
  0x1e   : > { %294 = vxpose.xlu0.b32.cont [2/6] (short) (narrow) %v197_v9, 8  ;;  %p732_p2 = por %p731_p1, %p730_p0 }
  0x1f   : > { %633 = vmatpush3.bf16.msra.mxu0 %v209_v8  ;;  %399 = vxpose.xlu1.b32.cont [2/6] (short) (narrow) %v203_v10, 8 }
  0x20   : > { %634 = vmatprep.subr.bf16.mxu0 %v785_v0  ;;  %p733_p3 = pnand %p732_p2, %p726_p13 }
  0x22   : > { %295 = vxpose.xlu0.b32.cont [3/6] (short) (narrow) %v198_v3, 8 }
  0x23   : > { %635 = vmatpush3.bf16.msra.mxu0 %v208_v11  ;;  %400 = vxpose.xlu1.b32.cont [3/6] (short) (narrow) %v204_v12, 8 }
  0x26   : > { %637 = vmatmul.mubr.msk.bf16.vlgmr.msra.gmra.mxu0 %vm226_vm1, %v720_v13  ;;  %296 = vxpose.xlu0.b32.cont [4/6] (short) (narrow) %v199_v5, 8 }
  0x27   : > { %640 = vmatprep.mubr.msk.bf16.mxu0 %vm786_vm0, %v785_v0  ;;  %401 = vxpose.xlu1.b32.cont [4/6] (short) (narrow) %v205_v14, 8 }
  0x2a   : > { %297 = vxpose.xlu0.b32.cont [5/6] (short) (narrow) %v200_v1, 8 }
  0x2b   : > { %402 = vxpose.xlu1.b32.cont [5/6] (short) (narrow) %v206_v15, 8 }
  0x2e   : > { %641 = vmatmul.mubr.msk.bf16.gmra.mxu0 %vm226_vm1, %v721_v16  ;;  %298 = vxpose.xlu0.b32.end [6/6] (short) (narrow) %v201_v2, 8 }
  0x2f   : > { %644 = vmatprep.mubr.msk.bf16.mxu0 %vm786_vm0, %v785_v0  ;;  %403 = vxpose.xlu1.b32.end [6/6] (short) (narrow) %v207_v17, 8 }
  0x36   : > { %645 = vmatmul.mubr.msk.bf16.gmra.mxu0 %vm226_vm1, %v722_v18 }
  0x96   : > { %v309_v31 = vpop.trf.xlu0 }
  0x97   : > { %v414_v32 = vpop.trf.xlu1 }
  0xe6   : > { %v270_v19 = vpop.f32.mrf.mxu0 }
  0xe8   : > { %v638_v20 = vpop.f32.mrf.mxu0 }
  0xea   : > { %v273_v21 = vpop.f32.mrf.mxu0 }
  0xec   : > { %v639_v22 = vpop.f32.mrf.mxu0 }
  0xee   : > { %v278_v23 = vpop.f32.mrf.mxu0 }
  0xf0   : > { %v642_v24 = vpop.f32.mrf.mxu0 }
  0xf2   : > { %v281_v25 = vpop.f32.mrf.mxu0 }
  0xf4   : > { %v643_v26 = vpop.f32.mrf.mxu0 }
  0xf6   : > { %v286_v27 = vpop.f32.mrf.mxu0 }
  0xf8   : > { %v646_v28 = vpop.f32.mrf.mxu0 }
  0xfa   : > { %v289_v29 = vpop.f32.mrf.mxu0 }
  0xfb   : > { %649 = vmatpush3.msra.mxu1 %v289_v29 }
  0xfc   : > { %v647_v30 = vpop.f32.mrf.mxu0  ;;  %650 = vmatprep.subr.mxu1 %v785_v0 }
  0xfd   : > { %651 = vmatpush3.msra.mxu1 %v286_v27 }
  0xfe   : > { %652 = vmatprep.subr.mxu1 %v785_v0 }
  0xff   : > { %653 = vmatpush3.msra.mxu1 %v281_v25 }
 0x100   : > { %654 = vmatprep.subr.mxu1 %v785_v0 }
 0x101   : > { %655 = vmatpush3.msra.mxu1 %v278_v23 }
 0x102   : > { %656 = vmatprep.subr.mxu1 %v785_v0 }
 0x103   : > { %657 = vmatpush3.msra.mxu1 %v273_v21 }
 0x104   : > { %658 = vmatprep.subr.mxu1 %v785_v0 }
 0x105   : > { %659 = vmatpush3.msra.mxu1 %v270_v19 }
 0x106   : > { %661 = vmatmul.mubr.msk.f32.vlgmr.msra.gmra.mxu1 %vm226_vm1, %v309_v31  ;;  %663 = vmatprep.subr.mxu1 %v785_v0 }
 0x107   : > { %664 = vmatpush3.msra.mxu1 %v207_v17  ;;  %675 = vmatprep.mubr.msk.f32.mxu1 %vm786_vm0, %v785_v0 }
 0x108   : > { %665 = vmatprep.subr.mxu1 %v785_v0 }
 0x109   : > { %666 = vmatpush3.msra.mxu1 %v206_v15 }
 0x10a   : > { %667 = vmatprep.subr.mxu1 %v785_v0 }
 0x10b   : > { %668 = vmatpush3.msra.mxu1 %v205_v14 }
 0x10c   : > { %669 = vmatprep.subr.mxu1 %v785_v0 }
 0x10d   : > { %670 = vmatpush3.msra.mxu1 %v204_v12 }
 0x10e   : > { %671 = vmatprep.subr.mxu1 %v785_v0 }
 0x10f   : > { %672 = vmatpush3.msra.mxu1 %v203_v10 }
 0x110   : > { %673 = vmatprep.subr.mxu1 %v785_v0 }
 0x111   : > { %674 = vmatpush3.msra.mxu1 %v873_v7 }
 0x112   : > { %676 = vmatmul.mubr.msk.f32.vlgmr.msra.gmra.mxu1 %vm226_vm1, %v414_v32 }
 0x1c6   : > { %v394_v33 = vpop.f32.mrf.mxu1 }
 0x1c8   : > { %v662_v34 = vpop.f32.mrf.mxu1 }
 0x1d2   : > { %v499_v35 = vpop.f32.mrf.mxu1 }
 0x1d3   : > { %v503_v36 = vsub.f32 %v394_v33, %v499_v35 }
 0x1d4   : > { %v677_v37 = vpop.f32.mrf.mxu1 }
 0x1d5   : > { %505 = vst.msk [vmem:[%s178_s20] sm:$0xff] %vm504_vm2, %v503_v36 }
 0x1d6   : > { %736 = shalt.err (!%p733_p3)
}
 0x1d7   : > { %s737_s5 = scalar_lea.hbm %s920_s27, 128  ;;  %s741_s8 = scalar_lea.hbm %s958_s3, 256 }
 0x1d8   : > { %p738_p4 = scmp.ne.s32.totalorder %s920_s27, %s737_s5  ;;  %p742_p9 = scmp.lt.s32.totalorder %s920_s27, %s958_s3 }
 0x1d9   : > { %p743_p10 = scmp.lt.s32.totalorder %s741_s8, %s737_s5 }
 0x1da   : > { %p739_p7 = pnand %p738_p4, %p846_p5 }
 0x1db   : > { %p744_p11 = por %p743_p10, %p742_p9 }
 0x1dc   : > { %p740_p8 = pneg %p739_p7 }
 0x1de   : > { %p745_p12 = pnand %p744_p11, %p740_p8 }
 0x1e0   : > { %748 = shalt.err (!%p745_p12)
}
 0x1e1   : > { %679 = dma.vmem_to_hbm [thread:$0]  (%p846_p5), %s521_s24, 128, %s920_s27, %s507_s28  }
 0x1e2 PF: > { %p685_p13 = scmp.ge.s32.totalorder %s783_s15, 2  ;;  %s532_s11 = sand.u32 1, %s771_s12  }
 0x1e3   : > { %s533_s17 = scalar_lea.sflag [#allocation3], %s532_s11 }
 0x1e4   : > { %p682_p0 = pnand %p685_p13, %p850_p6 }
 0x1e6   : > { %p683_p1 = pneg %p682_p0 }
 0x1e8   : > { %766 = dma.done.wait (%p683_p1), %s533_s17, 128  }
 0x1e9   : > { %768 = vsyncadd (%p683_p1), %s533_s17, 4294967168  ;;  %p13_p2 = scmp.ge.s32.totalorder %s833_s18, 4   ;;  %s961_s12 = smov %s775_s13 }
 0x1ea   : > { %s962_s13 = smov %s779_s14  ;;  %s963_s14 = smov %s844_s21 }
 0x1eb   : > { %s964_s15 = smov %s833_s18  ;;  %15 = sbr.rel (!%p13_p2) target bundleno = 3 (0x3), region = 70 }
 0x1f0   :  { %538 = vsyncpa [#allocation3], 1 }
 0x1f1   :  { %540 = vsyncpa [#allocation3 + $0x1], 1 }

</bundles_post_ra>
